<compile_context>
chip_gen: v7x
topology: tpu7x:2x2x1
jax: 0.10.0
libtpu: 0.0.40
codegen_flags: <defaults>
</compile_context>

<pallas_src>
import functools

import jax
import jax.numpy as jnp
from jax.experimental import pallas as pl
from jax.experimental.pallas import tpu as pltpu

LANES = 128            # vreg lane width
SUBLANES = 8           # vreg sublane count
MAX_BLOCK_ROWS = 2048  # rows per grid step: 2048 x 128 f32 = 1 MiB per input tile


def _combo_loss_kernel(full_rows, tail, block_rows, steps,
                       x_ref, t_ref,
                       inter_ref, psum_ref, tsum_ref, bce_ref):
    """Accumulate per-chunk partial sums of p*t, p, t and per-element BCE."""
    c = pl.program_id(0)            # parallel chunk (megacore split on v7x)
    s = pl.program_id(1)            # sequential step within the chunk

    @pl.when(s == 0)
    def _init():
        inter_ref[...] = jnp.zeros_like(inter_ref)
        psum_ref[...] = jnp.zeros_like(psum_ref)
        tsum_ref[...] = jnp.zeros_like(tsum_ref)
        bce_ref[...] = jnp.zeros_like(bce_ref)

    x_raw = x_ref[...].astype(jnp.float32)
    t_raw = t_ref[...].astype(jnp.float32)

    def sigmoid_and_bce(x, t):
        # Fused logits-space sigmoid / BCE: 1 exp + 1 log1p (+ 1 divide) per elem.
        # softplus(x) = -log(1 - sigmoid(x)),  softplus(-x) = -log(sigmoid(x)).
        e = jnp.exp(-jnp.abs(x))
        log1p_e = jnp.log1p(e)
        sp_pos = jnp.maximum(x, 0.0) + log1p_e
        sp_neg = jnp.maximum(-x, 0.0) + log1p_e
        # torch.nn.functional.binary_cross_entropy clamps each log term at -100,
        # i.e. each positive term at 100.
        bce_el = (t * jnp.minimum(sp_neg, 100.0)
                  + (1.0 - t) * jnp.minimum(sp_pos, 100.0))
        p = jnp.where(x >= 0.0, 1.0, e) / (1.0 + e)   # sigmoid(x), stable
        return p, bce_el

    def accumulate(inter_el, p_el, t_el, bce_el):
        # Sublane reduce only; cross-lane reduce + scalar epilogue happen in JAX.
        inter_ref[0:1, :] += jnp.sum(inter_el, axis=0, keepdims=True)
        psum_ref[0:1, :] += jnp.sum(p_el, axis=0, keepdims=True)
        tsum_ref[0:1, :] += jnp.sum(t_el, axis=0, keepdims=True)
        bce_ref[0:1, :] += jnp.sum(bce_el, axis=0, keepdims=True)

    # Global row of this block's first element (logical, un-clamped index).
    row0 = (c * steps + s) * block_rows
    fully_valid = row0 + block_rows <= full_rows   # no element index >= n here

    @pl.when(fully_valid)
    def _fast():                                   # steady-state: no mask math
        p, bce_el = sigmoid_and_bce(x_raw, t_raw)
        accumulate(p * t_raw, p, t_raw, bce_el)

    @pl.when(jnp.logical_not(fully_valid))
    def _masked():                                 # ragged / boundary block
        row_g = row0 + jax.lax.broadcasted_iota(jnp.int32, x_raw.shape, 0)
        lane = jax.lax.broadcasted_iota(jnp.int32, x_raw.shape, 1)
        valid = (row_g < full_rows) | ((row_g == full_rows) & (lane < tail))
        # Sanitize before any transcendental: boundary-block data may be garbage
        # (NaN/Inf bits) and NaN*0 would poison a mask-multiply-only scheme.
        x = jnp.where(valid, x_raw, 0.0)
        t = jnp.where(valid, t_raw, 0.0)
        m = valid.astype(jnp.float32)
        p, bce_el = sigmoid_and_bce(x, t)
        accumulate(p * t, p * m, t, bce_el * m)


@functools.partial(jax.jit, static_argnames=("alpha", "gamma", "smooth"))
def combo_loss(inputs, targets, alpha=0.8, gamma=2, smooth=1.0):
    """JAX/Pallas equivalent of ComboLoss.forward(inputs, targets)."""
    x = inputs.reshape(-1)        # keep native dtype; cast happens in-kernel
    t = targets.reshape(-1)
    n = x.shape[0]

    # Pad only to whole (8, 128) tiles; usually a no-op (pad == 0).
    align = SUBLANES * LANES
    pad = (-n) % align
    if pad:
        x = jnp.pad(x, (0, pad))
        t = jnp.pad(t, (0, pad))
    rows = (n + pad) // LANES                      # multiple of SUBLANES

    if rows <= MAX_BLOCK_ROWS:                     # whole problem in one block
        block_rows, num_chunks, steps = rows, 1, 1
    else:
        block_rows = MAX_BLOCK_ROWS
        total = -(-rows // block_rows)
        num_chunks = 2 if total >= 2 else 1        # megacore split (v7x)
        steps = -(-total // num_chunks)
    total_blocks = -(-rows // block_rows)
    max_block = total_blocks - 1                   # clamp: never a fully-OOB DMA

    xp = x.reshape(rows, LANES)
    tp = t.reshape(rows, LANES)

    kernel = functools.partial(_combo_loss_kernel,
                               n // LANES, n % LANES, block_rows, steps)
    # Clamped block index: a grid point past the last real block re-reads the
    # last block; its contribution is zeroed by the in-kernel mask (which uses
    # the un-clamped logical index), so correctness is unaffected.
    in_spec = pl.BlockSpec(
        (block_rows, LANES),
        lambda c, s: (jnp.minimum(c * steps + s, max_block), 0))
    acc_spec = pl.BlockSpec((SUBLANES, LANES), lambda c, s: (c, 0))
    acc_shape = jax.ShapeDtypeStruct((num_chunks * SUBLANES, LANES), jnp.float32)

    inter_p, psum_p, tsum_p, bce_p = pl.pallas_call(
        kernel,
        out_shape=(acc_shape,) * 4,
        grid_spec=pltpu.PrefetchScalarGridSpec(
            num_scalar_prefetch=0,
            grid=(num_chunks, steps),
            in_specs=[in_spec, in_spec],
            out_specs=(acc_spec,) * 4,
        ),
        compiler_params=pltpu.CompilerParams(
            dimension_semantics=("parallel", "arbitrary")),
    )(xp, tp)

    # Tiny scalar epilogue in plain JAX (fused into the same jit).
    intersection = jnp.sum(inter_p)
    sum_p = jnp.sum(psum_p)
    sum_t = jnp.sum(tsum_p)
    bce = jnp.sum(bce_p) / jnp.float32(n)                       # reduction='mean'
    dice_loss = 1.0 - (2.0 * intersection + smooth) / (sum_p + sum_t + smooth)
    focal_loss = alpha * (1.0 - jnp.exp(-bce)) ** gamma * bce
    return bce + dice_loss + focal_loss
    # TODO(synk): a fully copy-free path for inputs whose flat size is not a
    # multiple of 1024 would need manual DMA of the ragged tail from pl.ANY refs.


def _reference_combo_loss(inputs, targets, alpha=0.8, gamma=2, smooth=1.0):
    # Direct transcription of the PyTorch module (p-space BCE, log clamp at -100).
    p = jax.nn.sigmoid(inputs.reshape(-1).astype(jnp.float32))
    t = targets.reshape(-1).astype(jnp.float32)
    intersection = jnp.sum(p * t)
    dice = 1.0 - (2.0 * intersection + smooth) / (jnp.sum(p) + jnp.sum(t) + smooth)
    bce_el = -(t * jnp.maximum(jnp.log(p), -100.0)
               + (1.0 - t) * jnp.maximum(jnp.log1p(-p), -100.0))
    bce = jnp.mean(bce_el)
    focal = alpha * (1.0 - jnp.exp(-bce)) ** gamma * bce
    return bce + dice + focal


if __name__ == "__main__":
    key = jax.random.PRNGKey(0)
    k1, k2, k3, k4, k5, k6 = jax.random.split(key, 6)

    # Case 1: small NCHW shape matching typical module usage (single block, fast path).
    logits1 = jax.random.normal(k1, (2, 4, 16, 16), dtype=jnp.float32)
    targets1 = (jax.random.uniform(k2, (2, 4, 16, 16)) > 0.5).astype(jnp.float32)
    loss1 = jax.block_until_ready(combo_loss(logits1, targets1))
    ref1 = _reference_combo_loss(logits1, targets1)
    assert jnp.allclose(loss1, ref1, rtol=1e-4, atol=1e-4), (loss1, ref1)

    # Case 2: larger shape exercising the 2-chunk (megacore) split, boundary-block
    # padding and the clamped out-of-range grid step.
    logits2 = jax.random.normal(k3, (4, 8, 128, 80), dtype=jnp.float32)
    targets2 = (jax.random.uniform(k4, (4, 8, 128, 80)) > 0.5).astype(jnp.float32)
    loss2 = jax.block_until_ready(combo_loss(logits2, targets2))
    ref2 = _reference_combo_loss(logits2, targets2)
    assert jnp.allclose(loss2, ref2, rtol=1e-4, atol=1e-4), (loss2, ref2)

    # Case 3: flat size not a multiple of 128 — exercises wrapper pad + lane-tail mask.
    logits3 = jax.random.normal(k5, (3, 5, 7, 11), dtype=jnp.float32)
    targets3 = (jax.random.uniform(k6, (3, 5, 7, 11)) > 0.5).astype(jnp.float32)
    loss3 = jax.block_until_ready(combo_loss(logits3, targets3))
    ref3 = _reference_combo_loss(logits3, targets3)
    assert jnp.allclose(loss3, ref3, rtol=1e-4, atol=1e-4), (loss3, ref3)

    print("KERNEL_OK")
</pallas_src>

<mosaic_0001>
module attributes {stable_mosaic.version = 11 : i64} {
  func.func @_combo_loss_kernel(%arg0: i32, %arg1: i32, %arg2: memref<16x128xf32, #tpu.memory_space<vmem>>, %arg3: memref<16x128xf32, #tpu.memory_space<vmem>>, %arg4: memref<8x128xf32, #tpu.memory_space<vmem>>, %arg5: memref<8x128xf32, #tpu.memory_space<vmem>>, %arg6: memref<8x128xf32, #tpu.memory_space<vmem>>, %arg7: memref<8x128xf32, #tpu.memory_space<vmem>>) attributes {dimension_semantics = [#tpu.dimension_semantics<parallel>, #tpu.dimension_semantics<arbitrary>], iteration_bounds = array<i64: 1, 1>, scalar_prefetch = 0 : i64, scratch_operands = 0 : i64, tpu.core_type = #tpu.core_type<tc>, window_params = [{transform_indices = @transform_0, window_bounds = array<i64: 16, 128>}, {transform_indices = @transform_1, window_bounds = array<i64: 16, 128>}, {transform_indices = @transform_2, window_bounds = array<i64: 8, 128>}, {transform_indices = @transform_3, window_bounds = array<i64: 8, 128>}, {transform_indices = @transform_4, window_bounds = array<i64: 8, 128>}, {transform_indices = @transform_5, window_bounds = array<i64: 8, 128>}]} {
    %c0_i32 = arith.constant 0 : i32
    %0 = arith.cmpi eq, %arg1, %c0_i32 : i32
    %1 = arith.extui %0 : i1 to i32
    %c0_i32_0 = arith.constant 0 : i32
    %2 = arith.cmpi ne, %1, %c0_i32_0 : i32
    scf.if %2 {
      %cst = arith.constant 0.000000e+00 : f32
      %15 = vector.broadcast %cst : f32 to vector<8x128xf32>
      %c0_8 = arith.constant 0 : index
      %c0_9 = arith.constant 0 : index
      %16 = vector.load %arg4[%c0_8, %c0_9] : memref<8x128xf32, #tpu.memory_space<vmem>>, vector<8x128xf32>
      tpu.vector_store %arg4[%c0_8, %c0_9], %15 {strides = array<i32>} : memref<8x128xf32, #tpu.memory_space<vmem>>, vector<8x128xf32>,
      %cst_10 = arith.constant 0.000000e+00 : f32
      %17 = vector.broadcast %cst_10 : f32 to vector<8x128xf32>
      %c0_11 = arith.constant 0 : index
      %c0_12 = arith.constant 0 : index
      %18 = vector.load %arg5[%c0_11, %c0_12] : memref<8x128xf32, #tpu.memory_space<vmem>>, vector<8x128xf32>
      tpu.vector_store %arg5[%c0_11, %c0_12], %17 {strides = array<i32>} : memref<8x128xf32, #tpu.memory_space<vmem>>, vector<8x128xf32>,
      %cst_13 = arith.constant 0.000000e+00 : f32
      %19 = vector.broadcast %cst_13 : f32 to vector<8x128xf32>
      %c0_14 = arith.constant 0 : index
      %c0_15 = arith.constant 0 : index
      %20 = vector.load %arg6[%c0_14, %c0_15] : memref<8x128xf32, #tpu.memory_space<vmem>>, vector<8x128xf32>
      tpu.vector_store %arg6[%c0_14, %c0_15], %19 {strides = array<i32>} : memref<8x128xf32, #tpu.memory_space<vmem>>, vector<8x128xf32>,
      %cst_16 = arith.constant 0.000000e+00 : f32
      %21 = vector.broadcast %cst_16 : f32 to vector<8x128xf32>
      %c0_17 = arith.constant 0 : index
      %c0_18 = arith.constant 0 : index
      %22 = vector.load %arg7[%c0_17, %c0_18] : memref<8x128xf32, #tpu.memory_space<vmem>>, vector<8x128xf32>
      tpu.vector_store %arg7[%c0_17, %c0_18], %21 {strides = array<i32>} : memref<8x128xf32, #tpu.memory_space<vmem>>, vector<8x128xf32>,
    } else {
    }
    %c0 = arith.constant 0 : index
    %c0_1 = arith.constant 0 : index
    %3 = vector.load %arg2[%c0, %c0_1] : memref<16x128xf32, #tpu.memory_space<vmem>>, vector<16x128xf32>
    %c0_2 = arith.constant 0 : index
    %c0_3 = arith.constant 0 : index
    %4 = vector.load %arg3[%c0_2, %c0_3] : memref<16x128xf32, #tpu.memory_space<vmem>>, vector<16x128xf32>
    %c1_i32 = arith.constant 1 : i32
    %5 = arith.muli %arg0, %c1_i32 : i32
    %6 = arith.addi %5, %arg1 : i32
    %c16_i32 = arith.constant 16 : i32
    %7 = arith.muli %6, %c16_i32 : i32
    %c16_i32_4 = arith.constant 16 : i32
    %8 = arith.addi %7, %c16_i32_4 : i32
    %c16_i32_5 = arith.constant 16 : i32
    %9 = arith.cmpi sle, %8, %c16_i32_5 : i32
    %10 = arith.extui %9 : i1 to i32
    %c0_i32_6 = arith.constant 0 : i32
    %11 = arith.cmpi ne, %10, %c0_i32_6 : i32
    scf.if %11 {
      %15 = math.absf %3 : vector<16x128xf32>
      %cst = arith.constant 0.000000e+00 : f32
      %16 = vector.broadcast %cst : f32 to vector<16x128xf32>
      %17 = arith.subf %16, %15 : vector<16x128xf32>
      %18 = math.exp %17 : vector<16x128xf32>
      %19 = math.log1p %18 : vector<16x128xf32>
      %cst_8 = arith.constant 0.000000e+00 : f32
      %20 = vector.broadcast %cst_8 : f32 to vector<16x128xf32>
      %21 = arith.maximumf %3, %20 : vector<16x128xf32>
      %22 = arith.addf %21, %19 : vector<16x128xf32>
      %cst_9 = arith.constant 0.000000e+00 : f32
      %23 = vector.broadcast %cst_9 : f32 to vector<16x128xf32>
      %24 = arith.subf %23, %3 : vector<16x128xf32>
      %cst_10 = arith.constant 0.000000e+00 : f32
      %25 = vector.broadcast %cst_10 : f32 to vector<16x128xf32>
      %26 = arith.maximumf %24, %25 : vector<16x128xf32>
      %27 = arith.addf %26, %19 : vector<16x128xf32>
      %cst_11 = arith.constant 1.000000e+02 : f32
      %28 = vector.broadcast %cst_11 : f32 to vector<16x128xf32>
      %29 = arith.minimumf %27, %28 : vector<16x128xf32>
      %30 = arith.mulf %4, %29 : vector<16x128xf32>
      %cst_12 = arith.constant 1.000000e+00 : f32
      %31 = vector.broadcast %cst_12 : f32 to vector<16x128xf32>
      %32 = arith.subf %31, %4 : vector<16x128xf32>
      %cst_13 = arith.constant 1.000000e+02 : f32
      %33 = vector.broadcast %cst_13 : f32 to vector<16x128xf32>
      %34 = arith.minimumf %22, %33 : vector<16x128xf32>
      %35 = arith.mulf %32, %34 : vector<16x128xf32>
      %36 = arith.addf %30, %35 : vector<16x128xf32>
      %cst_14 = arith.constant 0.000000e+00 : f32
      %37 = vector.broadcast %cst_14 : f32 to vector<16x128xf32>
      %38 = arith.cmpf oge, %3, %37 : vector<16x128xf32>
      %cst_15 = arith.constant 1.000000e+00 : f32
      %39 = vector.broadcast %cst_15 : f32 to vector<16x128xf32>
      %40 = arith.select %38, %39, %18 : vector<16x128xi1>, vector<16x128xf32>
      %cst_16 = arith.constant 1.000000e+00 : f32
      %41 = vector.broadcast %cst_16 : f32 to vector<16x128xf32>
      %42 = arith.addf %41, %18 : vector<16x128xf32>
      %43 = arith.divf %40, %42 : vector<16x128xf32>
      %44 = arith.mulf %43, %4 : vector<16x128xf32>
      %c0_17 = arith.constant 0 : index
      %c0_18 = arith.constant 0 : index
      %45 = vector.load %arg4[%c0_17, %c0_18] : memref<8x128xf32, #tpu.memory_space<vmem>>, vector<1x128xf32>
      %cst_19 = arith.constant dense<0.000000e+00> : vector<128xf32>
      %46 = vector.multi_reduction <add>, %44, %cst_19 [0] : vector<16x128xf32> to vector<128xf32>
      %47 = vector.shape_cast %46 : vector<128xf32> to vector<1x128xf32>
      %48 = arith.addf %45, %47 : vector<1x128xf32>
      %c0_20 = arith.constant 0 : index
      %c0_21 = arith.constant 0 : index
      %49 = vector.load %arg4[%c0_20, %c0_21] : memref<8x128xf32, #tpu.memory_space<vmem>>, vector<1x128xf32>
      tpu.vector_store %arg4[%c0_20, %c0_21], %48 {strides = array<i32>} : memref<8x128xf32, #tpu.memory_space<vmem>>, vector<1x128xf32>,
      %c0_22 = arith.constant 0 : index
      %c0_23 = arith.constant 0 : index
      %50 = vector.load %arg5[%c0_22, %c0_23] : memref<8x128xf32, #tpu.memory_space<vmem>>, vector<1x128xf32>
      %cst_24 = arith.constant dense<0.000000e+00> : vector<128xf32>
      %51 = vector.multi_reduction <add>, %43, %cst_24 [0] : vector<16x128xf32> to vector<128xf32>
      %52 = vector.shape_cast %51 : vector<128xf32> to vector<1x128xf32>
      %53 = arith.addf %50, %52 : vector<1x128xf32>
      %c0_25 = arith.constant 0 : index
      %c0_26 = arith.constant 0 : index
      %54 = vector.load %arg5[%c0_25, %c0_26] : memref<8x128xf32, #tpu.memory_space<vmem>>, vector<1x128xf32>
      tpu.vector_store %arg5[%c0_25, %c0_26], %53 {strides = array<i32>} : memref<8x128xf32, #tpu.memory_space<vmem>>, vector<1x128xf32>,
      %c0_27 = arith.constant 0 : index
      %c0_28 = arith.constant 0 : index
      %55 = vector.load %arg6[%c0_27, %c0_28] : memref<8x128xf32, #tpu.memory_space<vmem>>, vector<1x128xf32>
      %cst_29 = arith.constant dense<0.000000e+00> : vector<128xf32>
      %56 = vector.multi_reduction <add>, %4, %cst_29 [0] : vector<16x128xf32> to vector<128xf32>
      %57 = vector.shape_cast %56 : vector<128xf32> to vector<1x128xf32>
      %58 = arith.addf %55, %57 : vector<1x128xf32>
      %c0_30 = arith.constant 0 : index
      %c0_31 = arith.constant 0 : index
      %59 = vector.load %arg6[%c0_30, %c0_31] : memref<8x128xf32, #tpu.memory_space<vmem>>, vector<1x128xf32>
      tpu.vector_store %arg6[%c0_30, %c0_31], %58 {strides = array<i32>} : memref<8x128xf32, #tpu.memory_space<vmem>>, vector<1x128xf32>,
      %c0_32 = arith.constant 0 : index
      %c0_33 = arith.constant 0 : index
      %60 = vector.load %arg7[%c0_32, %c0_33] : memref<8x128xf32, #tpu.memory_space<vmem>>, vector<1x128xf32>
      %cst_34 = arith.constant dense<0.000000e+00> : vector<128xf32>
      %61 = vector.multi_reduction <add>, %36, %cst_34 [0] : vector<16x128xf32> to vector<128xf32>
      %62 = vector.shape_cast %61 : vector<128xf32> to vector<1x128xf32>
      %63 = arith.addf %60, %62 : vector<1x128xf32>
      %c0_35 = arith.constant 0 : index
      %c0_36 = arith.constant 0 : index
      %64 = vector.load %arg7[%c0_35, %c0_36] : memref<8x128xf32, #tpu.memory_space<vmem>>, vector<1x128xf32>
      tpu.vector_store %arg7[%c0_35, %c0_36], %63 {strides = array<i32>} : memref<8x128xf32, #tpu.memory_space<vmem>>, vector<1x128xf32>,
    } else {
    }
    %true = arith.constant true
    %12 = arith.xori %9, %true : i1
    %13 = arith.extui %12 : i1 to i32
    %c0_i32_7 = arith.constant 0 : i32
    %14 = arith.cmpi ne, %13, %c0_i32_7 : i32
    scf.if %14 {
      %15 = tpu.iota {dimensions = array<i32: 0>} : vector<16x128xi32>
      %16 = vector.broadcast %7 : i32 to vector<16x128xi32>
      %17 = arith.addi %16, %15 : vector<16x128xi32>
      %18 = tpu.iota {dimensions = array<i32: 1>} : vector<16x128xi32>
      %c16_i32_8 = arith.constant 16 : i32
      %19 = vector.broadcast %c16_i32_8 : i32 to vector<16x128xi32>
      %20 = arith.cmpi slt, %17, %19 : vector<16x128xi32>
      %c16_i32_9 = arith.constant 16 : i32
      %21 = vector.broadcast %c16_i32_9 : i32 to vector<16x128xi32>
      %22 = arith.cmpi eq, %17, %21 : vector<16x128xi32>
      %c0_i32_10 = arith.constant 0 : i32
      %23 = vector.broadcast %c0_i32_10 : i32 to vector<16x128xi32>
      %24 = arith.cmpi slt, %18, %23 : vector<16x128xi32>
      %25 = arith.andi %22, %24 : vector<16x128xi1>
      %26 = arith.ori %20, %25 : vector<16x128xi1>
      %cst = arith.constant 0.000000e+00 : f32
      %27 = vector.broadcast %cst : f32 to vector<16x128xf32>
      %28 = arith.select %26, %3, %27 : vector<16x128xi1>, vector<16x128xf32>
      %cst_11 = arith.constant 0.000000e+00 : f32
      %29 = vector.broadcast %cst_11 : f32 to vector<16x128xf32>
      %30 = arith.select %26, %4, %29 : vector<16x128xi1>, vector<16x128xf32>
      %31 = arith.extui %26 : vector<16x128xi1> to vector<16x128xi32>
      %32 = arith.sitofp %31 : vector<16x128xi32> to vector<16x128xf32>
      %33 = math.absf %28 : vector<16x128xf32>
      %cst_12 = arith.constant 0.000000e+00 : f32
      %34 = vector.broadcast %cst_12 : f32 to vector<16x128xf32>
      %35 = arith.subf %34, %33 : vector<16x128xf32>
      %36 = math.exp %35 : vector<16x128xf32>
      %37 = math.log1p %36 : vector<16x128xf32>
      %cst_13 = arith.constant 0.000000e+00 : f32
      %38 = vector.broadcast %cst_13 : f32 to vector<16x128xf32>
      %39 = arith.maximumf %28, %38 : vector<16x128xf32>
      %40 = arith.addf %39, %37 : vector<16x128xf32>
      %cst_14 = arith.constant 0.000000e+00 : f32
      %41 = vector.broadcast %cst_14 : f32 to vector<16x128xf32>
      %42 = arith.subf %41, %28 : vector<16x128xf32>
      %cst_15 = arith.constant 0.000000e+00 : f32
      %43 = vector.broadcast %cst_15 : f32 to vector<16x128xf32>
      %44 = arith.maximumf %42, %43 : vector<16x128xf32>
      %45 = arith.addf %44, %37 : vector<16x128xf32>
      %cst_16 = arith.constant 1.000000e+02 : f32
      %46 = vector.broadcast %cst_16 : f32 to vector<16x128xf32>
      %47 = arith.minimumf %45, %46 : vector<16x128xf32>
      %48 = arith.mulf %30, %47 : vector<16x128xf32>
      %cst_17 = arith.constant 1.000000e+00 : f32
      %49 = vector.broadcast %cst_17 : f32 to vector<16x128xf32>
      %50 = arith.subf %49, %30 : vector<16x128xf32>
      %cst_18 = arith.constant 1.000000e+02 : f32
      %51 = vector.broadcast %cst_18 : f32 to vector<16x128xf32>
      %52 = arith.minimumf %40, %51 : vector<16x128xf32>
      %53 = arith.mulf %50, %52 : vector<16x128xf32>
      %54 = arith.addf %48, %53 : vector<16x128xf32>
      %cst_19 = arith.constant 0.000000e+00 : f32
      %55 = vector.broadcast %cst_19 : f32 to vector<16x128xf32>
      %56 = arith.cmpf oge, %28, %55 : vector<16x128xf32>
      %cst_20 = arith.constant 1.000000e+00 : f32
      %57 = vector.broadcast %cst_20 : f32 to vector<16x128xf32>
      %58 = arith.select %56, %57, %36 : vector<16x128xi1>, vector<16x128xf32>
      %cst_21 = arith.constant 1.000000e+00 : f32
      %59 = vector.broadcast %cst_21 : f32 to vector<16x128xf32>
      %60 = arith.addf %59, %36 : vector<16x128xf32>
      %61 = arith.divf %58, %60 : vector<16x128xf32>
      %62 = arith.mulf %61, %30 : vector<16x128xf32>
      %63 = arith.mulf %61, %32 : vector<16x128xf32>
      %64 = arith.mulf %54, %32 : vector<16x128xf32>
      %c0_22 = arith.constant 0 : index
      %c0_23 = arith.constant 0 : index
      %65 = vector.load %arg4[%c0_22, %c0_23] : memref<8x128xf32, #tpu.memory_space<vmem>>, vector<1x128xf32>
      %cst_24 = arith.constant dense<0.000000e+00> : vector<128xf32>
      %66 = vector.multi_reduction <add>, %62, %cst_24 [0] : vector<16x128xf32> to vector<128xf32>
      %67 = vector.shape_cast %66 : vector<128xf32> to vector<1x128xf32>
      %68 = arith.addf %65, %67 : vector<1x128xf32>
      %c0_25 = arith.constant 0 : index
      %c0_26 = arith.constant 0 : index
      %69 = vector.load %arg4[%c0_25, %c0_26] : memref<8x128xf32, #tpu.memory_space<vmem>>, vector<1x128xf32>
      tpu.vector_store %arg4[%c0_25, %c0_26], %68 {strides = array<i32>} : memref<8x128xf32, #tpu.memory_space<vmem>>, vector<1x128xf32>,
      %c0_27 = arith.constant 0 : index
      %c0_28 = arith.constant 0 : index
      %70 = vector.load %arg5[%c0_27, %c0_28] : memref<8x128xf32, #tpu.memory_space<vmem>>, vector<1x128xf32>
      %cst_29 = arith.constant dense<0.000000e+00> : vector<128xf32>
      %71 = vector.multi_reduction <add>, %63, %cst_29 [0] : vector<16x128xf32> to vector<128xf32>
      %72 = vector.shape_cast %71 : vector<128xf32> to vector<1x128xf32>
      %73 = arith.addf %70, %72 : vector<1x128xf32>
      %c0_30 = arith.constant 0 : index
      %c0_31 = arith.constant 0 : index
      %74 = vector.load %arg5[%c0_30, %c0_31] : memref<8x128xf32, #tpu.memory_space<vmem>>, vector<1x128xf32>
      tpu.vector_store %arg5[%c0_30, %c0_31], %73 {strides = array<i32>} : memref<8x128xf32, #tpu.memory_space<vmem>>, vector<1x128xf32>,
      %c0_32 = arith.constant 0 : index
      %c0_33 = arith.constant 0 : index
      %75 = vector.load %arg6[%c0_32, %c0_33] : memref<8x128xf32, #tpu.memory_space<vmem>>, vector<1x128xf32>
      %cst_34 = arith.constant dense<0.000000e+00> : vector<128xf32>
      %76 = vector.multi_reduction <add>, %30, %cst_34 [0] : vector<16x128xf32> to vector<128xf32>
      %77 = vector.shape_cast %76 : vector<128xf32> to vector<1x128xf32>
      %78 = arith.addf %75, %77 : vector<1x128xf32>
      %c0_35 = arith.constant 0 : index
      %c0_36 = arith.constant 0 : index
      %79 = vector.load %arg6[%c0_35, %c0_36] : memref<8x128xf32, #tpu.memory_space<vmem>>, vector<1x128xf32>
      tpu.vector_store %arg6[%c0_35, %c0_36], %78 {strides = array<i32>} : memref<8x128xf32, #tpu.memory_space<vmem>>, vector<1x128xf32>,
      %c0_37 = arith.constant 0 : index
      %c0_38 = arith.constant 0 : index
      %80 = vector.load %arg7[%c0_37, %c0_38] : memref<8x128xf32, #tpu.memory_space<vmem>>, vector<1x128xf32>
      %cst_39 = arith.constant dense<0.000000e+00> : vector<128xf32>
      %81 = vector.multi_reduction <add>, %64, %cst_39 [0] : vector<16x128xf32> to vector<128xf32>
      %82 = vector.shape_cast %81 : vector<128xf32> to vector<1x128xf32>
      %83 = arith.addf %80, %82 : vector<1x128xf32>
      %c0_40 = arith.constant 0 : index
      %c0_41 = arith.constant 0 : index
      %84 = vector.load %arg7[%c0_40, %c0_41] : memref<8x128xf32, #tpu.memory_space<vmem>>, vector<1x128xf32>
      tpu.vector_store %arg7[%c0_40, %c0_41], %83 {strides = array<i32>} : memref<8x128xf32, #tpu.memory_space<vmem>>, vector<1x128xf32>,
    } else {
    }
    return
  }
  func.func @transform_0(%arg0: i32, %arg1: i32) -> (i32, i32) {
    %c1_i32 = arith.constant 1 : i32
    %0 = arith.muli %arg0, %c1_i32 : i32
    %1 = arith.addi %0, %arg1 : i32
    %c0_i32 = arith.constant 0 : i32
    %2 = arith.minsi %1, %c0_i32 : i32
    %c0_i32_0 = arith.constant 0 : i32
    %c0_i32_1 = arith.constant 0 : i32
    return %2, %c0_i32_0 : i32, i32
  }
  func.func @transform_1(%arg0: i32, %arg1: i32) -> (i32, i32) {
    %c1_i32 = arith.constant 1 : i32
    %0 = arith.muli %arg0, %c1_i32 : i32
    %1 = arith.addi %0, %arg1 : i32
    %c0_i32 = arith.constant 0 : i32
    %2 = arith.minsi %1, %c0_i32 : i32
    %c0_i32_0 = arith.constant 0 : i32
    %c0_i32_1 = arith.constant 0 : i32
    return %2, %c0_i32_0 : i32, i32
  }
  func.func @transform_2(%arg0: i32, %arg1: i32) -> (i32, i32) {
    %c0_i32 = arith.constant 0 : i32
    %c0_i32_0 = arith.constant 0 : i32
    return %arg0, %c0_i32 : i32, i32
  }
  func.func @transform_3(%arg0: i32, %arg1: i32) -> (i32, i32) {
    %c0_i32 = arith.constant 0 : i32
    %c0_i32_0 = arith.constant 0 : i32
    return %arg0, %c0_i32 : i32, i32
  }
  func.func @transform_4(%arg0: i32, %arg1: i32) -> (i32, i32) {
    %c0_i32 = arith.constant 0 : i32
    %c0_i32_0 = arith.constant 0 : i32
    return %arg0, %c0_i32 : i32, i32
  }
  func.func @transform_5(%arg0: i32, %arg1: i32) -> (i32, i32) {
    %c0_i32 = arith.constant 0 : i32
    %c0_i32_0 = arith.constant 0 : i32
    return %arg0, %c0_i32 : i32, i32
  }
}

</mosaic_0001>

<bundles_post_ra>
// kernel: combo_loss.1
= control target key start
LH: loop header
LB: loop body
LE: loop exit
PB: predicated region body
PF: predicated region fallthrough
CT: control target
= control target key end

     0   :  { %v372_v0 = vmov 0.0   ;;  %s475_s2 = inlined_call_operand.vmem [shape: f32[8,128], index: 2, kind: output, shape index: {0}]   ;;  %s476_s3 = inlined_call_operand.vmem [shape: f32[8,128], index: 3, kind: output, shape index: {1}]   ;;  %s477_s4 = inlined_call_operand.vmem [shape: f32[8,128], index: 4, kind: output, shape index: {2}]   ;;  %s478_s5 = inlined_call_operand.vmem [shape: f32[8,128], index: 5, kind: output, shape index: {3}]   ;;  %s479_s0 = inlined_call_operand.vmem [shape: f32[16,128], index: 0, kind: input, shape index: {}]   ;;  %s480_s1 = inlined_call_operand.vmem [shape: f32[16,128], index: 1, kind: input, shape index: {}]  }
   0x1   :  { %83 = vst [vmem:[%s475_s2] sm:$0xff] %v372_v0  ;;  %84 = vst [vmem:[%s476_s3] sm:$0xff] %v372_v0  ;;  %v418_v1 = vld [vmem:[%s479_s0] sm:$0xff]  ;;  %v423_v2 = vld [vmem:[%s479_s0 + $0x8] sm:$0xff] }
   0x2   :  { %85 = vst [vmem:[%s477_s4] sm:$0xff] %v372_v0  ;;  %86 = vst [vmem:[%s478_s5] sm:$0xff] %v372_v0  ;;  %v428_v3 = vld [vmem:[%s480_s1] sm:$0xff]  ;;  %v433_v4 = vld [vmem:[%s480_s1 + $0x8] sm:$0xff]  ;;  %v98_v5 = vand.u32 2147483647, %v418_v1  ;;  %v99_v6 = vand.u32 2147483647, %v423_v2 }
   0x3   :  { %v179_v7 = vadd.f32 %v433_v4, %v428_v3  ;;  %vm146_vm0 = vcmp.ge.f32.partialorder %v418_v1, 0.0  ;;  %vm147_vm1 = vcmp.ge.f32.partialorder %v423_v2, 0.0  ;;  %v128_v30 = vsub.f32 0.0, %v418_v1 }
   0x4   :  { %v100_v8 = vsub.f32 0.0, %v98_v5  ;;  %v101_v9 = vsub.f32 0.0, %v99_v6  ;;  %v129_v33 = vsub.f32 0.0, %v423_v2  ;;  %v124_v38 = vmax.f32 %v418_v1, 0.0 }
   0x5   :  { %v180_v10 = vrot.slane %v179_v7, 4  ;;  %v125_v39 = vmax.f32 %v423_v2, 0.0  ;;  %v130_v43 = vmax.f32 %v128_v30, 0.0  ;;  %v138_v52 = vsub.f32 1.0, %v428_v3 }
   0x6   :  { %v102_v11 = vmul.f32 1.442695, %v100_v8  ;;  %v104_v12 = vmul.f32 1.442695, %v101_v9  ;;  %v131_v47 = vmax.f32 %v129_v33, 0.0  ;;  %v139_v60 = vsub.f32 1.0, %v433_v4 }
   0x7   :  { %v181_v13 = vadd.f32 %v180_v10, %v179_v7 }
   0x8   :  { %360 = vpow2.f32 %v102_v11 }
   0x9   :  { %362 = vpow2.f32 %v104_v12  ;;  %v182_v14 = vrot.slane %v181_v13, 2  ;;  %v178_v17 = vld [vmem:[%s477_s4] sm:$0x1] }
   0xb   :  { %v183_v15 = vadd.f32 %v182_v14, %v181_v13 }
   0xd   :  { %v184_v16 = vrot.slane %v183_v15, 1 }
   0xf   :  { %v185_v18 = vadd.f32 %v184_v16, %v183_v15 }
  0x11   :  { %v186_v19 = vadd.f32 %v185_v18, %v178_v17  ;;  %v168_v17 = vld [vmem:[%s476_s3] sm:$0x1] }
  0x12   :  { %v361_v20 = vpop.eup %360 }
  0x13   :  { %v363_v21 = vpop.eup %362  ;;  %v106_v22 = vadd.f32 1.0, %v361_v20  ;;  %187 = vst [vmem:[%s477_s4] sm:$0x1] %v186_v19  ;;  %v109_v24 = vmul.f32 -0.5, %v361_v20  ;;  %v148_v27 = vsel %vm146_vm0, 1.0, %v361_v20  ;;  %v112_v28 = vand.u32 2147483647, %v361_v20 }
  0x14   :  { %v115_v23 = vadd.f32 1.0, %v363_v21  ;;  %v118_v25 = vmul.f32 -0.5, %v363_v21  ;;  %v149_v31 = vsel %vm147_vm1, 1.0, %v363_v21  ;;  %v121_v32 = vand.u32 2147483647, %v363_v21 }
  0x15   :  { %364 = vrcp.f32 %v106_v22  ;;  %v110_v26 = vadd.f32 1.0, %v109_v24  ;;  %vm113_vm2 = vcmp.lt.f32.partialorder %v112_v28, 0.0004427343  ;;  %v188_v28 = vld [vmem:[%s478_s5] sm:$0x1] }
  0x16   :  { %366 = vrcp.f32 %v115_v23  ;;  %v119_v29 = vadd.f32 1.0, %v118_v25  ;;  %vm122_vm3 = vcmp.lt.f32.partialorder %v121_v32, 0.0004427343 }
  0x17   :  { %368 = vlog2.f32 %v106_v22  ;;  %v111_v37 = vmul.f32 %v361_v20, %v110_v26 }
  0x18   :  { %370 = vlog2.f32 %v115_v23  ;;  %v120_v42 = vmul.f32 %v363_v21, %v119_v29 }
  0x1f   :  { %v365_v34 = vpop.eup %364 }
  0x20   :  { %v367_v35 = vpop.eup %366  ;;  %v153_v36 = vmul.f32 %v365_v34, %v148_v27 }
  0x21   :  { %v369_v40 = vpop.eup %368  ;;  %v155_v41 = vmul.f32 %v367_v35, %v149_v31 }
  0x22   :  { %v371_v44 = vpop.eup %370  ;;  %v156_v45 = vmul.f32 %v153_v36, %v428_v3  ;;  %v108_v46 = vmul.f32 0.6931472, %v369_v40 }
  0x23   :  { %v157_v48 = vmul.f32 %v155_v41, %v433_v4  ;;  %v169_v49 = vadd.f32 %v155_v41, %v153_v36  ;;  %v117_v50 = vmul.f32 0.6931472, %v371_v44 }
  0x24   :  { %v114_v51 = vsel %vm113_vm2, %v111_v37, %v108_v46 }
  0x25   :  { %v159_v53 = vadd.f32 %v157_v48, %v156_v45  ;;  %v170_v54 = vrot.slane %v169_v49, 4  ;;  %v123_v55 = vsel %vm122_vm3, %v120_v42, %v117_v50  ;;  %v126_v56 = vadd.f32 %v124_v38, %v114_v51 }
  0x26   :  { %v127_v57 = vadd.f32 %v125_v39, %v123_v55  ;;  %v132_v58 = vadd.f32 %v130_v43, %v114_v51  ;;  %v133_v59 = vadd.f32 %v131_v47, %v123_v55 }
  0x27   :  { %v160_v61 = vrot.slane %v159_v53, 4  ;;  %v171_v62 = vadd.f32 %v170_v54, %v169_v49  ;;  %v140_v63 = vmin.f32 %v126_v56, 100.0 }
  0x28   :  { %v134_v0 = vmin.f32 %v132_v58, 100.0  ;;  %v135_v1 = vmin.f32 %v133_v59, 100.0  ;;  %v141_v2 = vmin.f32 %v127_v57, 100.0 }
  0x29   :  { %v161_v5 = vadd.f32 %v160_v61, %v159_v53  ;;  %v172_v6 = vrot.slane %v171_v62, 2  ;;  %v142_v7 = vmul.f32 %v140_v63, %v138_v52 }
  0x2a   :  { %v136_v8 = vmul.f32 %v134_v0, %v428_v3  ;;  %v137_v9 = vmul.f32 %v135_v1, %v433_v4  ;;  %v143_v10 = vmul.f32 %v141_v2, %v139_v60  ;;  %v158_v3 = vld [vmem:[%s475_s2] sm:$0x1] }
  0x2b   :  { %v162_v11 = vrot.slane %v161_v5, 2  ;;  %v173_v12 = vadd.f32 %v172_v6, %v171_v62 }
  0x2c   :  { %v144_v13 = vadd.f32 %v142_v7, %v136_v8  ;;  %v145_v14 = vadd.f32 %v143_v10, %v137_v9 }
  0x2d   :  { %v163_v15 = vadd.f32 %v162_v11, %v161_v5  ;;  %v174_v16 = vrot.slane %v173_v12, 1 }
  0x2e   :  { %v189_v18 = vadd.f32 %v145_v14, %v144_v13 }
  0x2f   :  { %v164_v19 = vrot.slane %v163_v15, 1  ;;  %v175_v20 = vadd.f32 %v174_v16, %v173_v12 }
  0x30   :  { %v190_v21 = vrot.slane %v189_v18, 4 }
  0x31   :  { %v165_v4 = vadd.f32 %v164_v19, %v163_v15  ;;  %v176_v22 = vadd.f32 %v175_v20, %v168_v17 }
  0x32   :  { %v191_v23 = vadd.f32 %v190_v21, %v189_v18 }
  0x33   :  { %v166_v24 = vadd.f32 %v165_v4, %v158_v3  ;;  %177 = vst [vmem:[%s476_s3] sm:$0x1] %v176_v22 }
  0x34   :  { %v192_v25 = vrot.slane %v191_v23, 2 }
  0x35   :  { %167 = vst [vmem:[%s475_s2] sm:$0x1] %v166_v24 }
  0x36   :  { %v193_v26 = vadd.f32 %v192_v25, %v191_v23 }
  0x38   :  { %v194_v27 = vrot.slane %v193_v26, 1 }
  0x3a   :  { %v195_v29 = vadd.f32 %v194_v27, %v193_v26 }
  0x3c   :  { %v196_v30 = vadd.f32 %v195_v29, %v188_v28 }
  0x3e   :  { %197 = vst [vmem:[%s478_s5] sm:$0x1] %v196_v30 }

</bundles_post_ra>
